<compile_context>
chip_gen: v7x
topology: tpu7x:2x2x1
jax: 0.10.0
libtpu: 0.0.40
codegen_flags: <defaults>
</compile_context>

<pallas_src>
import jax
import jax.numpy as jnp
from jax.experimental import pallas as pl
from jax.experimental.pallas import tpu as pltpu

DPAD = 8                       # 8-wide augmented point encoding (coords + norms + pad)
_COST_TILE_BUDGET = 8 << 20    # keep the live f32 cost tile <= ~8 MiB (v7x-safe)


def _chamfer_kernel(p1_ref, p2_ref, d1_ref, d2_ref):
    # p1_ref: (BB, N, 8) augmented points
    # p2_ref: (BB, 8, MT) augmented + transposed points
    # d1_ref: (BB, N)  running min over column tiles (resident across m axis)
    # d2_ref: (BB, MT) per-column-tile min
    m_idx = pl.program_id(1)

    @pl.when(m_idx == 0)
    def _init():
        d1_ref[...] = jnp.full(d1_ref.shape, jnp.inf, d1_ref.dtype)

    # Single MXU contraction produces the squared-distance tile directly: the
    # -2 scale and both squared norms live in the 8-wide encodings, so no VPU
    # pass touches the (N, MT) matrix.
    cost = jnp.einsum(
        "bnd,bdm->bnm", p1_ref[...], p2_ref[...],
        preferred_element_type=jnp.float32,
    )  # (BB, N, MT) float32

    # dist1: running min over column tiles (lane-direction min -> XLU).
    d1_ref[...] = jnp.minimum(d1_ref[...], jnp.min(cost, axis=2))
    # dist2: min over N for this tile (sublane-direction min -> VPU-friendly).
    # Clamp AFTER the min: equivalent because the true min is >= 0.
    d2_ref[...] = jnp.maximum(jnp.min(cost, axis=1), 0.0)

    @pl.when(m_idx == pl.num_programs(1) - 1)
    def _finalize():
        d1_ref[...] = jnp.maximum(d1_ref[...], 0.0)


def _batch_block(B):
    if B <= 8:
        return B
    if B % 8 == 0:
        return 8
    # TODO(synk): pad the batch axis for large B not divisible by 8 instead of
    #             falling back to one whole-batch block.
    return B


def _m_tile(bb, N, M):
    # Tile M only when it can stay lane-aligned (multiple of 128) and the
    # untiled cost tile would blow the budget.
    if M % 128 != 0 or bb * N * M * 4 <= _COST_TILE_BUDGET:
        # TODO(synk): tile non-128-multiple M via a padded final column tile.
        return M
    best = None
    for mt in range(128, M + 1, 128):
        if M % mt == 0 and bb * N * mt * 4 <= _COST_TILE_BUDGET:
            best = mt  # keep the largest fitting divisor
    return best if best is not None else 128


def _vmem_limit_bytes(bb, N, MT):
    inputs = 2 * 2 * (bb * N * DPAD + bb * DPAD * MT) * 4   # double-buffered input blocks
    outputs = 2 * 2 * (bb * N + bb * MT) * 4                # double-buffered output blocks
    temps = 3 * bb * N * MT * 4                             # cost tile + reduction temporaries
    need = inputs + outputs + temps + (4 << 20)             # headroom
    return int(min(max(need, 32 << 20), 100 << 20))


def chamfer_per_point(pcs1, pcs2):
    """pcs1: (B, N, D), pcs2: (B, M, D) -> (dist1 (B, N), dist2 (B, M))."""
    B, N, D = pcs1.shape
    B2, M, D2 = pcs2.shape
    assert B == B2 and D == D2 and D + 2 <= DPAD

    p1 = pcs1.astype(jnp.float32)
    p2 = pcs2.astype(jnp.float32)
    sq1 = jnp.sum(p1 * p1, axis=-1, keepdims=True)           # (B, N, 1)
    sq2 = jnp.sum(p2 * p2, axis=-1, keepdims=True)           # (B, M, 1)
    pad1 = jnp.zeros((B, N, DPAD - D - 2), jnp.float32)
    pad2 = jnp.zeros((B, M, DPAD - D - 2), jnp.float32)
    # Augmented encodings: one matmul yields squared distances directly.
    p1a = jnp.concatenate([p1, sq1, jnp.ones_like(sq1), pad1], axis=-1)          # (B, N, 8)
    p2a = jnp.concatenate([-2.0 * p2, jnp.ones_like(sq2), sq2, pad2], axis=-1)   # (B, M, 8)
    p2a = jnp.transpose(p2a, (0, 2, 1))                                          # (B, 8, M)

    BB = _batch_block(B)
    MT = _m_tile(BB, N, M)
    grid = (B // BB, M // MT)

    flops = B * (2 * N * M * DPAD + 2 * N * M)          # matmul + two min passes
    bytes_accessed = B * ((N + M) * DPAD + N + M) * 4

    d1, d2 = pl.pallas_call(
        _chamfer_kernel,
        out_shape=(
            jax.ShapeDtypeStruct((B, N), jnp.float32),
            jax.ShapeDtypeStruct((B, M), jnp.float32),
        ),
        grid_spec=pltpu.PrefetchScalarGridSpec(
            num_scalar_prefetch=0,
            grid=grid,
            in_specs=[
                pl.BlockSpec((BB, N, DPAD), lambda b, m: (b, 0, 0)),
                pl.BlockSpec((BB, DPAD, MT), lambda b, m: (b, 0, m)),
            ],
            out_specs=[
                pl.BlockSpec((BB, N), lambda b, m: (b, 0)),   # resident over m axis
                pl.BlockSpec((BB, MT), lambda b, m: (b, m)),
            ],
        ),
        compiler_params=pltpu.CompilerParams(
            dimension_semantics=("parallel", "arbitrary"),
            vmem_limit_bytes=_vmem_limit_bytes(BB, N, MT),
        ),
        cost_estimate=pl.CostEstimate(
            flops=int(flops), transcendentals=0, bytes_accessed=int(bytes_accessed)
        ),
    )(p1a, p2a)
    return d1, d2


@jax.jit
def chamfer_distance(pcs1, pcs2):
    """Forward of ChamferDistance: (mean(sqrt(dist1)) + mean(sqrt(dist2))) / 2."""
    d1, d2 = chamfer_per_point(pcs1, pcs2)
    return (jnp.mean(jnp.sqrt(d1)) + jnp.mean(jnp.sqrt(d2))) / 2.0


if __name__ == "__main__":
    key = jax.random.PRNGKey(0)
    k1, k2 = jax.random.split(key)
    B, N, M, D = 2, 64, 64, 3
    pcs1 = jax.random.uniform(k1, (B, N, D), dtype=jnp.float32)
    pcs2 = jax.random.uniform(k2, (B, M, D), dtype=jnp.float32)

    out = jax.block_until_ready(chamfer_distance(pcs1, pcs2))

    # Pure-JAX reference (direct difference formulation).
    diff = pcs1[:, :, None, :] - pcs2[:, None, :, :]
    cost = jnp.sum(diff * diff, axis=-1)
    ref = (jnp.mean(jnp.sqrt(jnp.min(cost, axis=2)))
           + jnp.mean(jnp.sqrt(jnp.min(cost, axis=1)))) / 2.0

    assert out.shape == () and bool(jnp.isfinite(out)), out
    assert jnp.allclose(out, ref, rtol=2e-3, atol=1e-5), (float(out), float(ref))
    print("KERNEL_OK")
</pallas_src>

<mosaic_0001>
module attributes {stable_mosaic.version = 11 : i64} {
  func.func @_chamfer_kernel(%arg0: i32, %arg1: i32, %arg2: memref<2x64x8xf32, #tpu.memory_space<vmem>>, %arg3: memref<2x8x64xf32, #tpu.memory_space<vmem>>, %arg4: memref<2x64xf32, #tpu.memory_space<vmem>>, %arg5: memref<2x64xf32, #tpu.memory_space<vmem>>) attributes {dimension_semantics = [#tpu.dimension_semantics<parallel>, #tpu.dimension_semantics<arbitrary>], iteration_bounds = array<i64: 1, 1>, scalar_prefetch = 0 : i64, scratch_operands = 0 : i64, tpu.core_type = #tpu.core_type<tc>, window_params = [{transform_indices = @transform_0, window_bounds = array<i64: 2, 64, 8>}, {transform_indices = @transform_1, window_bounds = array<i64: 2, 8, 64>}, {transform_indices = @transform_2, window_bounds = array<i64: 2, 64>}, {transform_indices = @transform_3, window_bounds = array<i64: 2, 64>}]} {
    %c0_i32 = arith.constant 0 : i32
    %0 = arith.cmpi eq, %arg1, %c0_i32 : i32
    %1 = arith.extui %0 : i1 to i32
    %c0_i32_0 = arith.constant 0 : i32
    %2 = arith.cmpi ne, %1, %c0_i32_0 : i32
    scf.if %2 {
      %cst_17 = arith.constant 0x7F800000 : f32
      %17 = vector.broadcast %cst_17 : f32 to vector<2x64xf32>
      %c0_18 = arith.constant 0 : index
      %c0_19 = arith.constant 0 : index
      %18 = vector.load %arg4[%c0_18, %c0_19] : memref<2x64xf32, #tpu.memory_space<vmem>>, vector<2x64xf32>
      tpu.vector_store %arg4[%c0_18, %c0_19], %17 {strides = array<i32>} : memref<2x64xf32, #tpu.memory_space<vmem>>, vector<2x64xf32>,
    } else {
    }
    %c0 = arith.constant 0 : index
    %c0_1 = arith.constant 0 : index
    %c0_2 = arith.constant 0 : index
    %3 = vector.load %arg2[%c0, %c0_1, %c0_2] : memref<2x64x8xf32, #tpu.memory_space<vmem>>, vector<2x64x8xf32>
    %c0_3 = arith.constant 0 : index
    %c0_4 = arith.constant 0 : index
    %c0_5 = arith.constant 0 : index
    %4 = vector.load %arg3[%c0_3, %c0_4, %c0_5] : memref<2x8x64xf32, #tpu.memory_space<vmem>>, vector<2x8x64xf32>
    "tpu.trace_start"() <{level = 10 : i32, message = "bnd,bdm->bnm"}> : () -> ()
    %cst = arith.constant dense<0.000000e+00> : vector<2x64x64xf32>
    %5 = tpu.matmul %3, %4, %cst {dimension_numbers = #tpu.dot_dimension_numbers<[2], [1], [1], [2], [0, 0, 0, 1, 1, 2], [0], [0]>} : vector<2x64x8xf32>, vector<2x8x64xf32>, vector<2x64x64xf32> -> vector<2x64x64xf32>
    "tpu.trace_stop"() : () -> ()
    %c0_6 = arith.constant 0 : index
    %c0_7 = arith.constant 0 : index
    %6 = vector.load %arg4[%c0_6, %c0_7] : memref<2x64xf32, #tpu.memory_space<vmem>>, vector<2x64xf32>
    %cst_8 = arith.constant dense<0x7F800000> : vector<2x64xf32>
    %7 = vector.multi_reduction <minimumf>, %5, %cst_8 [2] : vector<2x64x64xf32> to vector<2x64xf32>
    %8 = arith.minimumf %6, %7 : vector<2x64xf32>
    %c0_9 = arith.constant 0 : index
    %c0_10 = arith.constant 0 : index
    %9 = vector.load %arg4[%c0_9, %c0_10] : memref<2x64xf32, #tpu.memory_space<vmem>>, vector<2x64xf32>
    tpu.vector_store %arg4[%c0_9, %c0_10], %8 {strides = array<i32>} : memref<2x64xf32, #tpu.memory_space<vmem>>, vector<2x64xf32>,
    %cst_11 = arith.constant dense<0x7F800000> : vector<2x64xf32>
    %10 = vector.multi_reduction <minimumf>, %5, %cst_11 [1] : vector<2x64x64xf32> to vector<2x64xf32>
    %cst_12 = arith.constant 0.000000e+00 : f32
    %11 = vector.broadcast %cst_12 : f32 to vector<2x64xf32>
    %12 = arith.maximumf %10, %11 : vector<2x64xf32>
    %c0_13 = arith.constant 0 : index
    %c0_14 = arith.constant 0 : index
    %13 = vector.load %arg5[%c0_13, %c0_14] : memref<2x64xf32, #tpu.memory_space<vmem>>, vector<2x64xf32>
    tpu.vector_store %arg5[%c0_13, %c0_14], %12 {strides = array<i32>} : memref<2x64xf32, #tpu.memory_space<vmem>>, vector<2x64xf32>,
    %c0_i32_15 = arith.constant 0 : i32
    %14 = arith.cmpi eq, %arg1, %c0_i32_15 : i32
    %15 = arith.extui %14 : i1 to i32
    %c0_i32_16 = arith.constant 0 : i32
    %16 = arith.cmpi ne, %15, %c0_i32_16 : i32
    scf.if %16 {
      %c0_17 = arith.constant 0 : index
      %c0_18 = arith.constant 0 : index
      %17 = vector.load %arg4[%c0_17, %c0_18] : memref<2x64xf32, #tpu.memory_space<vmem>>, vector<2x64xf32>
      %cst_19 = arith.constant 0.000000e+00 : f32
      %18 = vector.broadcast %cst_19 : f32 to vector<2x64xf32>
      %19 = arith.maximumf %17, %18 : vector<2x64xf32>
      %c0_20 = arith.constant 0 : index
      %c0_21 = arith.constant 0 : index
      %20 = vector.load %arg4[%c0_20, %c0_21] : memref<2x64xf32, #tpu.memory_space<vmem>>, vector<2x64xf32>
      tpu.vector_store %arg4[%c0_20, %c0_21], %19 {strides = array<i32>} : memref<2x64xf32, #tpu.memory_space<vmem>>, vector<2x64xf32>,
    } else {
    }
    return
  }
  func.func @transform_0(%arg0: i32, %arg1: i32) -> (i32, i32, i32) {
    %c0_i32 = arith.constant 0 : i32
    %c0_i32_0 = arith.constant 0 : i32
    %c0_i32_1 = arith.constant 0 : i32
    return %arg0, %c0_i32, %c0_i32_0 : i32, i32, i32
  }
  func.func @transform_1(%arg0: i32, %arg1: i32) -> (i32, i32, i32) {
    %c0_i32 = arith.constant 0 : i32
    %c0_i32_0 = arith.constant 0 : i32
    return %arg0, %c0_i32, %arg1 : i32, i32, i32
  }
  func.func @transform_2(%arg0: i32, %arg1: i32) -> (i32, i32) {
    %c0_i32 = arith.constant 0 : i32
    %c0_i32_0 = arith.constant 0 : i32
    return %arg0, %c0_i32 : i32, i32
  }
  func.func @transform_3(%arg0: i32, %arg1: i32) -> (i32, i32) {
    %c0_i32 = arith.constant 0 : i32
    return %arg0, %arg1 : i32, i32
  }
}

</mosaic_0001>

<bundles_post_ra>
// kernel: chamfer_distance.1
= control target key start
LH: loop header
LB: loop body
LE: loop exit
PB: predicated region body
PF: predicated region fallthrough
CT: control target
= control target key end

     0   :  { %vm37_vm0 = vcmask 64512   ;;  %vm297_vm1 = vcmask 523264   ;;  %vm456_vm2 = vcmask 1041409   ;;  %vm17_vm3 = vcmask 517120   ;;  %s707_s1 = inlined_call_operand.vmem [shape: f32[2,8,64], index: 1, kind: input, shape index: {}]   ;;  %s708_s0 = inlined_call_operand.vmem [shape: f32[2,64,8], index: 0, kind: input, shape index: {}]   ;;  %s709_s3 = inlined_call_operand.vmem [shape: f32[2,64], index: 3, kind: output, shape index: {1}]   ;;  %s710_s2 = inlined_call_operand.vmem [shape: f32[2,64], index: 2, kind: output, shape index: {0}]  }
   0x1   :  { %v35_v0 = vld [vmem:[%s707_s1] sm:$0xff]  ;;  %v36_v1 = vld [vmem:[%s707_s1 + $0x8] sm:$0xff]  ;;  %v21_v6 = vld [vmem:[%s708_s0 + $0x10] sm:$0xff]  ;;  %vm373_vm4 = vcmask 130112   ;;  %vm380_vm5 = vcmask 195712   ;;  %vm387_vm6 = vcmask 261312  }
   0x2   :  { %v19_v2 = vld [vmem:[%s708_s0] sm:$0xff]  ;;  %543 = vmatprep.subr.mxu0 %v35_v0  ;;  %557 = vmatprep.subr.mxu1 %v36_v1  ;;  %v20_v4 = vld [vmem:[%s708_s0 + $0x8] sm:$0xff]  ;;  %v29_v7 = vld [vmem:[%s708_s0 + $0x50] sm:$0xff]  ;;  %vm394_vm7 = vcmask 326912   ;;  %vm401_vm8 = vcmask 392512   ;;  %vm408_vm9 = vcmask 458112  }
   0x3   :  { %v27_v3 = vld [vmem:[%s708_s0 + $0x40] sm:$0xff]  ;;  %v28_v5 = vld [vmem:[%s708_s0 + $0x48] sm:$0xff]  ;;  %544 = vmatpush3.msra.mxu0 %v35_v0  ;;  %545 = vmatprep.mubr.msk.f32.mxu0 %vm37_vm0, %v19_v2  ;;  %v22_v8 = vld [vmem:[%s708_s0 + $0x18] sm:$0xff]  ;;  %vm415_vm10 = vcmask 523712  }
   0x4   :  { %558 = vmatpush3.msra.mxu1 %v36_v1  ;;  %559 = vmatprep.mubr.msk.f32.mxu1 %vm37_vm0, %v27_v3  ;;  %v30_v9 = vld [vmem:[%s708_s0 + $0x58] sm:$0xff]  ;;  %v23_v10 = vld [vmem:[%s708_s0 + $0x20] sm:$0xff]  ;;  %v24_v12 = vld [vmem:[%s708_s0 + $0x28] sm:$0xff] }
   0x5   :  { %546 = vmatmul.mubr.msk.f32.vlgmr.msra.gmra.mrb[0].mxu0 %vm37_vm0, %v20_v4  ;;  %560 = vmatmul.mubr.msk.f32.vlgmr.msra.gmra.mrb[0].mxu1 %vm37_vm0, %v28_v5  ;;  %v31_v11 = vld [vmem:[%s708_s0 + $0x60] sm:$0xff]  ;;  %v32_v13 = vld [vmem:[%s708_s0 + $0x68] sm:$0xff]  ;;  %v25_v14 = vld [vmem:[%s708_s0 + $0x30] sm:$0xff] }
   0x6   :  { %548 = vmatprep.mubr.msk.f32.mxu0 %vm37_vm0, %v21_v6  ;;  %562 = vmatprep.mubr.msk.f32.mxu1 %vm37_vm0, %v29_v7  ;;  %v33_v15 = vld [vmem:[%s708_s0 + $0x70] sm:$0xff]  ;;  %v26_v16 = vld [vmem:[%s708_s0 + $0x38] sm:$0xff] }
   0x7   :  { %v34_v17 = vld [vmem:[%s708_s0 + $0x78] sm:$0xff] }
   0x9   :  { %549 = vmatmul.mubr.msk.f32.gmra.mrb[2].mxu0 %vm37_vm0, %v22_v8  ;;  %563 = vmatmul.mubr.msk.f32.gmra.mrb[2].mxu1 %vm37_vm0, %v30_v9 }
   0xa   :  { %551 = vmatprep.mubr.msk.f32.mxu0 %vm37_vm0, %v23_v10  ;;  %565 = vmatprep.mubr.msk.f32.mxu1 %vm37_vm0, %v31_v11 }
   0xd   :  { %552 = vmatmul.mubr.msk.f32.gmra.mrb[4].mxu0 %vm37_vm0, %v24_v12  ;;  %566 = vmatmul.mubr.msk.f32.gmra.mrb[4].mxu1 %vm37_vm0, %v32_v13 }
   0xe   :  { %554 = vmatprep.mubr.msk.f32.mxu0 %vm37_vm0, %v25_v14  ;;  %568 = vmatprep.mubr.msk.f32.mxu1 %vm37_vm0, %v33_v15  ;;  %v572_v15 = vmov inf  }
   0xf   :  { %18 = vst.msk [vmem:[%s710_s2] sm:$0x3] %vm17_vm3, %v572_v15 }
  0x11   :  { %555 = vmatmul.mubr.msk.f32.gmra.mrb[6].mxu0 %vm37_vm0, %v26_v16  ;;  %569 = vmatmul.mubr.msk.f32.gmra.mrb[6].mxu1 %vm37_vm0, %v34_v17 }
  0xd8   :  { %v547_v18 = vpop.f32.mrb[0].mxu0  ;;  %v561_v19 = vpop.f32.mrb[0].mxu1 }
  0xd9   :  { %v128_v20 = vpop.f32.mrb[1].mxu0  ;;  %v257_v21 = vpop.f32.mrb[1].mxu1  ;;  %v325_v22 = vsel %vm297_vm1, %v561_v19, inf  ;;  %v301_v23 = vsel %vm297_vm1, %v547_v18, inf  ;;  %v362_v18 = vlaneseq }
  0xda   :  { %326 = vmin.xlane.f32.xlu1 %v325_v22  ;;  %302 = vmin.xlane.f32.xlu0 %v301_v23  ;;  %v322_v28 = vsel %vm297_vm1, %v257_v21, inf  ;;  %v298_v29 = vsel %vm297_vm1, %v128_v20, inf }
  0xdb   :  { %v363_v21 = vand.u32 127, %v362_v18 }
  0xdc   :  { %v550_v24 = vpop.f32.mrb[2].mxu0  ;;  %v564_v25 = vpop.f32.mrb[2].mxu1 }
  0xdd   :  { %v138_v26 = vpop.f32.mrb[3].mxu0  ;;  %v267_v27 = vpop.f32.mrb[3].mxu1  ;;  %v331_v30 = vsel %vm297_vm1, %v564_v25, inf  ;;  %v307_v31 = vsel %vm297_vm1, %v550_v24, inf  ;;  %v375_v24 = vadd.s32 4294967280, %v363_v21  ;;  %v365_v25 = vshrl.u32 %v362_v18, 7 }
  0xde   :  { %323 = vmin.xlane.f32.xlu1 %v322_v28  ;;  %299 = vmin.xlane.f32.xlu0 %v298_v29  ;;  %v476_v32 = vmin.f32 %v325_v22, %v331_v30  ;;  %v463_v33 = vmin.f32 %v301_v23, %v307_v31  ;;  %v328_v34 = vsel %vm297_vm1, %v267_v27, inf  ;;  %v304_v35 = vsel %vm297_vm1, %v138_v26, inf }
  0xdf   :  { %v475_v36 = vmin.f32 %v322_v28, %v328_v34  ;;  %v462_v37 = vmin.f32 %v298_v29, %v304_v35  ;;  %v368_v26 = vadd.s32 4294967288, %v363_v21  ;;  %v366_v29 = vsub.s32 %v363_v21, %v365_v25 }
  0xe0   :  { %v553_v38 = vpop.f32.mrb[4].mxu0  ;;  %v567_v39 = vpop.f32.mrb[4].mxu1 }
  0xe1   :  { %v148_v40 = vpop.f32.mrb[5].mxu0  ;;  %v277_v41 = vpop.f32.mrb[5].mxu1  ;;  %v337_v42 = vsel %vm297_vm1, %v567_v39, inf  ;;  %v313_v43 = vsel %vm297_vm1, %v553_v38, inf  ;;  %v403_v38 = vadd.s32 4294967248, %v363_v21 }
  0xe2   :  { %332 = vmin.xlane.f32.xlu1 %v331_v30  ;;  %308 = vmin.xlane.f32.xlu0 %v307_v31  ;;  %v478_v44 = vmin.f32 %v476_v32, %v337_v42  ;;  %v465_v45 = vmin.f32 %v463_v33, %v313_v43  ;;  %v334_v46 = vsel %vm297_vm1, %v277_v41, inf  ;;  %v310_v47 = vsel %vm297_vm1, %v148_v40, inf }
  0xe3   :  { %v477_v48 = vmin.f32 %v475_v36, %v334_v46  ;;  %v464_v49 = vmin.f32 %v462_v37, %v310_v47  ;;  %v382_v30 = vadd.s32 4294967272, %v363_v21  ;;  %v378_v31 = vsub.s32 %v375_v24, %v365_v25 }
  0xe4   :  { %v556_v50 = vpop.f32.mrb[6].mxu0  ;;  %v570_v51 = vpop.f32.mrb[6].mxu1  ;;  %v389_v32 = vadd.s32 4294967264, %v363_v21  ;;  %v371_v33 = vsub.s32 %v368_v26, %v365_v25 }
  0xe5   :  { %v158_v52 = vpop.f32.mrb[7].mxu0  ;;  %v287_v53 = vpop.f32.mrb[7].mxu1  ;;  %v343_v54 = vsel %vm297_vm1, %v570_v51, inf  ;;  %v319_v55 = vsel %vm297_vm1, %v556_v50, inf  ;;  %v385_v39 = vsub.s32 %v382_v30, %v365_v25  ;;  %v406_v50 = vsub.s32 %v403_v38, %v365_v25 }
  0xe6   :  { %329 = vmin.xlane.f32.xlu1 %v328_v34  ;;  %305 = vmin.xlane.f32.xlu0 %v304_v35  ;;  %v340_v56 = vsel %vm297_vm1, %v287_v53, inf  ;;  %v316_v57 = vsel %vm297_vm1, %v158_v52, inf  ;;  %v480_v58 = vmin.f32 %v478_v44, %v343_v54  ;;  %v467_v59 = vmin.f32 %v465_v45, %v319_v55 }
  0xe7   :  { %v479_v60 = vmin.f32 %v477_v48, %v340_v56  ;;  %v466_v61 = vmin.f32 %v464_v49, %v316_v57  ;;  %v396_v45 = vadd.s32 4294967256, %v363_v21  ;;  %v410_v51 = vadd.s32 4294967240, %v363_v21 }
  0xe9   :  { %v481_v62 = vmin.f32 %v479_v60, %v480_v58  ;;  %v468_v63 = vmin.f32 %v466_v61, %v467_v59  ;;  %v399_v58 = vsub.s32 %v396_v45, %v365_v25 }
  0xea   :  { %338 = vmin.xlane.f32.xlu1 %v337_v42  ;;  %314 = vmin.xlane.f32.xlu0 %v313_v43  ;;  %v392_v42 = vsub.s32 %v389_v32, %v365_v25 }
  0xeb   :  { %v482_v0 = vrot.slane %v481_v62, 4  ;;  %v469_v1 = vrot.slane %v468_v63, 4 }
  0xed   :  { %v483_v2 = vmin.f32 %v481_v62, %v482_v0  ;;  %v470_v3 = vmin.f32 %v468_v63, %v469_v1  ;;  %v413_v63 = vsub.s32 %v410_v51, %v365_v25 }
  0xee   :  { %335 = vmin.xlane.f32.xlu1 %v334_v46  ;;  %311 = vmin.xlane.f32.xlu0 %v310_v47 }
  0xef   :  { %v484_v4 = vrot.slane %v483_v2, 2  ;;  %v471_v5 = vrot.slane %v470_v3, 2 }
  0xf1   :  { %v485_v6 = vmin.f32 %v483_v2, %v484_v4  ;;  %v472_v7 = vmin.f32 %v470_v3, %v471_v5 }
  0xf2   :  { %341 = vmin.xlane.f32.xlu1 %v340_v56  ;;  %317 = vmin.xlane.f32.xlu0 %v316_v57 }
  0xf3   :  { %v486_v8 = vrot.slane %v485_v6, 1  ;;  %v473_v9 = vrot.slane %v472_v7, 1 }
  0xf5   :  { %v487_v10 = vmin.f32 %v485_v6, %v486_v8  ;;  %v474_v11 = vmin.f32 %v472_v7, %v473_v9 }
  0xf6   :  { %344 = vmin.xlane.f32.xlu1 %v343_v54  ;;  %320 = vmin.xlane.f32.xlu0 %v319_v55 }
  0xf7   :  { %v489_v12 = vmax.f32 %v487_v10, 0.0  ;;  %v488_v13 = vmax.f32 %v474_v11, 0.0 }
  0xf9   :  { %v492_v14 = vsel %vm456_vm2, %v489_v12, %v488_v13 }
  0xfa   :  { %494 = vst.msk [vmem:[%s709_s3] sm:$0x3] %vm17_vm3, %v492_v14  ;;  %v296_v14 = vld [vmem:[%s710_s2] sm:$0x3] }
 0x167   :  { %v327_v16 = vpop.xlane.xlu1 %326  ;;  %v303_v17 = vpop.xlane.xlu0 %302 }
 0x168   :  { %v424_v43 = vrot.slane %v327_v16, %v371_v33  ;;  %v372_v44 = vrot.slane %v303_v17, %v371_v33 }
 0x16b   :  { %v324_v19 = vpop.xlane.xlu1 %323  ;;  %v300_v20 = vpop.xlane.xlu0 %299 }
 0x16c   :  { %v420_v36 = vrot.slane %v324_v19, %v366_v29  ;;  %v367_v37 = vrot.slane %v300_v20, %v366_v29 }
 0x16e   :  { %v425_v48 = vsel %vm373_vm4, %v424_v43, %v420_v36  ;;  %v374_v49 = vsel %vm373_vm4, %v372_v44, %v367_v37 }
 0x16f   :  { %v333_v22 = vpop.xlane.xlu1 %332  ;;  %v309_v23 = vpop.xlane.xlu0 %308 }
 0x170   :  { %v434_v56 = vrot.slane %v333_v22, %v385_v39  ;;  %v386_v57 = vrot.slane %v309_v23, %v385_v39 }
 0x173   :  { %v330_v27 = vpop.xlane.xlu1 %329  ;;  %v306_v28 = vpop.xlane.xlu0 %305 }
 0x174   :  { %v429_v40 = vrot.slane %v330_v27, %v378_v31  ;;  %v379_v41 = vrot.slane %v306_v28, %v378_v31 }
 0x176   :  { %v430_v52 = vsel %vm380_vm5, %v429_v40, %v425_v48  ;;  %v381_v53 = vsel %vm380_vm5, %v379_v41, %v374_v49 }
 0x177   :  { %v339_v34 = vpop.xlane.xlu1 %338  ;;  %v315_v35 = vpop.xlane.xlu0 %314  ;;  %v435_v61 = vsel %vm387_vm6, %v434_v56, %v430_v52  ;;  %v388_v62 = vsel %vm387_vm6, %v386_v57, %v381_v53 }
 0x178   :  { %v444_v4 = vrot.slane %v339_v34, %v399_v58  ;;  %v400_v5 = vrot.slane %v315_v35, %v399_v58 }
 0x17b   :  { %v336_v46 = vpop.xlane.xlu1 %335  ;;  %v312_v47 = vpop.xlane.xlu0 %311 }
 0x17c   :  { %v439_v54 = vrot.slane %v336_v46, %v392_v42  ;;  %v393_v55 = vrot.slane %v312_v47, %v392_v42 }
 0x17e   :  { %v440_v0 = vsel %vm394_vm7, %v439_v54, %v435_v61  ;;  %v395_v1 = vsel %vm394_vm7, %v393_v55, %v388_v62 }
 0x17f   :  { %v342_v59 = vpop.xlane.xlu1 %341  ;;  %v318_v60 = vpop.xlane.xlu0 %317  ;;  %v445_v8 = vsel %vm401_vm8, %v444_v4, %v440_v0  ;;  %v402_v9 = vsel %vm401_vm8, %v400_v5, %v395_v1 }
 0x180   :  { %v449_v2 = vrot.slane %v342_v59, %v406_v50  ;;  %v407_v3 = vrot.slane %v318_v60, %v406_v50 }
 0x182   :  { %v450_v12 = vsel %vm408_vm9, %v449_v2, %v445_v8  ;;  %v409_v13 = vsel %vm408_vm9, %v407_v3, %v402_v9 }
 0x183   :  { %v345_v6 = vpop.xlane.xlu1 %344  ;;  %v321_v7 = vpop.xlane.xlu0 %320 }
 0x184   :  { %v454_v10 = vrot.slane %v345_v6, %v413_v63  ;;  %v414_v11 = vrot.slane %v321_v7, %v413_v63 }
 0x186   :  { %v455_v15 = vsel %vm415_vm10, %v454_v10, %v450_v12  ;;  %v416_v16 = vsel %vm415_vm10, %v414_v11, %v409_v13 }
 0x187   :  { %v457_v17 = vsel %vm456_vm2, %v455_v15, %v416_v16 }
 0x188   :  { %v459_v18 = vmin.f32 %v296_v14, %v457_v17 }
 0x18a   :  { %461 = vst.msk [vmem:[%s710_s2] sm:$0x3] %vm17_vm3, %v459_v18 }
 0x191   :  { %v498_v19 = vld [vmem:[%s710_s2] sm:$0x3] }
 0x192   :  { %v499_v20 = vmax.f32 %v498_v19, 0.0 }
 0x194   :  { %500 = vst.msk [vmem:[%s710_s2] sm:$0x3] %vm17_vm3, %v499_v20 }

</bundles_post_ra>
